<compile_context>
chip_gen: v7x
topology: tpu7x:2x2x1
jax: 0.10.0
libtpu: 0.0.40
codegen_flags: <defaults>
</compile_context>

<pallas_src>
import functools

import jax
import jax.numpy as jnp
from jax.experimental import pallas as pl
from jax.experimental.pallas import tpu as pltpu

LANE = 128      # TPU lane width: pad the output feature dim for unmasked stores.
SUBLANE = 8     # TPU sublane count: pad the batch dim for aligned layout.


def fused_linear_kernel(x_ref, w_ref, b_ref, o_ref):
    # x_ref: (Bpad, In)      f32
    # w_ref: (In, OutPad)    f32  -- pre-transposed, pre-scaled by logspace
    # b_ref: (1, OutPad)     f32  -- pre-scaled by logspace
    # o_ref: (Bpad, OutPad)  f32  -- lane-dense (OutPad % 128 == 0)
    o_ref[...] = (
        jnp.dot(x_ref[...], w_ref[...], preferred_element_type=jnp.float32)
        + b_ref[...]
    )


def _round_up(n, m):
    return ((n + m - 1) // m) * m


def prepare_params(weight, bias, output_size):
    """One-time parameter prep (not per forward call):
    fold the constant torch.logspace(0, 1, steps=Out, dtype=float16) scale
    (= 10**linspace(0,1,Out), quantized to the f16 grid) into W and b,
    transpose W to (In, OutPad) with OutPad a multiple of 128."""
    logspace = jnp.power(10.0, jnp.linspace(0.0, 1.0, output_size, dtype=jnp.float32))
    scale = logspace.astype(jnp.float16).astype(jnp.float32)

    w_scaled = weight * scale[:, None]   # (Out, In)
    b_scaled = bias * scale              # (Out,)

    in_size = weight.shape[1]
    out_pad = _round_up(output_size, LANE)

    w_t = jnp.zeros((in_size, out_pad), jnp.float32).at[:, :output_size].set(w_scaled.T)
    b_p = jnp.zeros((1, out_pad), jnp.float32).at[:, :output_size].set(b_scaled)
    return w_t, b_p


@functools.partial(jax.jit, static_argnames=("output_size",))
def my_module_forward(x, w_t, b_p, output_size):
    """x: (B, In) f32; w_t: (In, OutPad) pre-scaled/transposed; b_p: (1, OutPad)."""
    B, in_size = x.shape
    out_pad = w_t.shape[1]

    # Pad batch to a sublane multiple so the x tile / output tile are aligned.
    b_pad = _round_up(max(B, SUBLANE), SUBLANE)
    if b_pad != B:
        x = jnp.zeros((b_pad, in_size), x.dtype).at[:B, :].set(x)

    out = pl.pallas_call(
        fused_linear_kernel,
        out_shape=jax.ShapeDtypeStruct((b_pad, out_pad), jnp.float32),
        in_specs=[
            pl.BlockSpec(memory_space=pltpu.MemorySpace.VMEM),
            pl.BlockSpec(memory_space=pltpu.MemorySpace.VMEM),
            pl.BlockSpec(memory_space=pltpu.MemorySpace.VMEM),
        ],
        out_specs=pl.BlockSpec(memory_space=pltpu.MemorySpace.VMEM),
    )(x, w_t, b_p)

    # Drop batch padding and the zero-padded output columns.
    return out[:B, :output_size]


if __name__ == "__main__":
    input_size = 32
    output_size = 16
    batch = 8

    key = jax.random.PRNGKey(0)
    kx, kw, kb = jax.random.split(key, 3)

    # deterministic parameter init (mimics nn.Linear uniform(-1/sqrt(in), 1/sqrt(in)))
    bound = 1.0 / jnp.sqrt(jnp.float32(input_size))
    weight = jax.random.uniform(kw, (output_size, input_size), jnp.float32, -bound, bound)
    bias = jax.random.uniform(kb, (output_size,), jnp.float32, -bound, bound)
    x = jax.random.normal(kx, (batch, input_size), jnp.float32)

    # one-time prep: fold scale, transpose, pad
    w_t, b_p = prepare_params(weight, bias, output_size)

    out = my_module_forward(x, w_t, b_p, output_size)
    out = jax.block_until_ready(out)

    # reference in original (un-folded) form: (x @ W^T + b) * logspace_f16
    logspace = jnp.power(10.0, jnp.linspace(0.0, 1.0, output_size, dtype=jnp.float32))
    scale = logspace.astype(jnp.float16).astype(jnp.float32)
    ref = (x @ weight.T + bias) * scale

    assert out.shape == ref.shape
    assert jnp.allclose(out, ref, atol=1e-4, rtol=1e-5), "mismatch vs reference"

    print("KERNEL_OK")
</pallas_src>

<mosaic_0001>
module attributes {stable_mosaic.version = 11 : i64} {
  func.func @fused_linear_kernel(%arg0: memref<8x32xf32, #tpu.memory_space<vmem>>, %arg1: memref<32x128xf32, #tpu.memory_space<vmem>>, %arg2: memref<1x128xf32, #tpu.memory_space<vmem>>, %arg3: memref<8x128xf32, #tpu.memory_space<vmem>>) attributes {dimension_semantics = [], scalar_prefetch = 0 : i64, scratch_operands = 0 : i64, tpu.core_type = #tpu.core_type<tc>} {
    %c0 = arith.constant 0 : index
    %c0_0 = arith.constant 0 : index
    %0 = vector.load %arg0[%c0, %c0_0] : memref<8x32xf32, #tpu.memory_space<vmem>>, vector<8x32xf32>
    %c0_1 = arith.constant 0 : index
    %c0_2 = arith.constant 0 : index
    %1 = vector.load %arg1[%c0_1, %c0_2] : memref<32x128xf32, #tpu.memory_space<vmem>>, vector<32x128xf32>
    %cst = arith.constant dense<0.000000e+00> : vector<8x128xf32>
    %2 = tpu.matmul %0, %1, %cst {dimension_numbers = #tpu.dot_dimension_numbers<[1], [0], [0], [1], [0, 0, 1, 1], [], []>} : vector<8x32xf32>, vector<32x128xf32>, vector<8x128xf32> -> vector<8x128xf32>
    %c0_3 = arith.constant 0 : index
    %c0_4 = arith.constant 0 : index
    %3 = vector.load %arg2[%c0_3, %c0_4] : memref<1x128xf32, #tpu.memory_space<vmem>>, vector<1x128xf32>
    %4 = vector.broadcast %3 : vector<1x128xf32> to vector<8x128xf32>
    %5 = arith.addf %2, %4 : vector<8x128xf32>
    %c0_5 = arith.constant 0 : index
    %c0_6 = arith.constant 0 : index
    %6 = vector.load %arg3[%c0_5, %c0_6] : memref<8x128xf32, #tpu.memory_space<vmem>>, vector<8x128xf32>
    tpu.vector_store %arg3[%c0_5, %c0_6], %5 {strides = array<i32>} : memref<8x128xf32, #tpu.memory_space<vmem>>, vector<8x128xf32>,
    return
  }
}

</mosaic_0001>

<bundles_post_ra>
// kernel: my_module_forward.1
= control target key start
LH: loop header
LB: loop body
LE: loop exit
PB: predicated region body
PF: predicated region fallthrough
CT: control target
= control target key end

     0   :  { %8 = vsyncpa [#allocation3], 0  ;;  %s322_s0 = inlined_call_operand.hbm [shape: f32[8,32], index: 0, kind: input, shape index: {}]   ;;  %s323_s1 = inlined_call_operand.hbm [shape: f32[32,128], index: 1, kind: input, shape index: {}]   ;;  %s324_s2 = inlined_call_operand.vmem [shape: f32[1,128], index: 2, kind: input, shape index: {}]   ;;  %s325_s3 = inlined_call_operand.hbm [shape: f32[8,128], index: 3, kind: output, shape index: {}]  }
   0x1   :  { %9 = vsyncpa [#allocation6], 0 }
   0x2   :  { %10 = vsyncpa [#allocation4], 0  ;;  %s248_s12 = smov [#allocation2]   ;;  %s249_s14 = smov [#allocation5]  }
   0x3   :  { %s17_s13 = sshll.u32 %s248_s12, 4  ;;  %s26_s15 = sshll.u32 %s249_s14, 4  ;;  %s18_s13 = int_to_ptr.vmem [resolvable:$true] %s17_s13  ;;  %s276_s15 = int_to_ptr.vmem [resolvable:$true] %s26_s15 }
   0x4   :  { %s176_s18 = scalar_lea.hbm %s322_s0, 128 }
   0x5   :  { %p177_p0 = scmp.ne.s32.totalorder %s322_s0, %s176_s18  ;;  %p180_p1 = scmp.lt.u32.totalorder %s176_s18, %s322_s0 }
   0x7   :  { %p182_p2 = pnand %p180_p1, %p177_p0 }
   0x9   :  { %185 = shalt.err (!%p182_p2)
}
   0xa   :  { %s186_s23 = scalar_lea.vmem %s18_s13, 128  ;;  %p191_p4 = scmp.lt.s32.totalorder %s18_s13, %s18_s13 }
   0xb   :  { %p187_p3 = scmp.ne.s32.totalorder %s18_s13, %s186_s23  ;;  %p192_p5 = scmp.lt.s32.totalorder %s186_s23, %s186_s23 }
   0xd   :  { %p193_p6 = por %p192_p5, %p191_p4 }
   0xf   :  { %p194_p7 = pnand %p193_p6, %p187_p3 }
  0x11   :  { %197 = shalt.err (!%p194_p7)
}
  0x12   :  { %20 = dma.hbm_to_vmem [thread:$0]  %s322_s0, 128, %s18_s13, [#allocation3]  }
  0x13   :  { %s198_s28 = scalar_lea.hbm %s323_s1, 512 }
  0x14   :  { %p199_p8 = scmp.ne.s32.totalorder %s323_s1, %s198_s28  ;;  %p202_p9 = scmp.lt.u32.totalorder %s198_s28, %s323_s1 }
  0x16   :  { %p204_p10 = pnand %p202_p9, %p199_p8 }
  0x18   :  { %207 = shalt.err (!%p204_p10)
}
  0x19   :  { %s208_s6 = scalar_lea.vmem %s276_s15, 512  ;;  %p213_p12 = scmp.lt.s32.totalorder %s276_s15, %s276_s15 }
  0x1a   :  { %p209_p11 = scmp.ne.s32.totalorder %s276_s15, %s208_s6  ;;  %p214_p13 = scmp.lt.s32.totalorder %s208_s6, %s208_s6 }
  0x1c   :  { %p215_p0 = por %p214_p13, %p213_p12 }
  0x1e   :  { %p216_p1 = pnand %p215_p0, %p209_p11 }
  0x20   :  { %219 = shalt.err (!%p216_p1)
}
  0x21   :  { %s250_s0 = smov 128   ;;  %s251_s7 = smov 8  }
  0x22   :  { %32 = dma.hbm_to_vmem [thread:$0]  %s323_s1, 512, %s276_s15, [#allocation6], %s250_s0, %s250_s0, %s251_s7  }
  0x23   :  { %242 = dma.done.wait [#allocation3], 128  }
  0x24   :  { %243 = vsyncadd [#allocation3], 4294967168 }
  0x25   :  { %244 = dma.done.wait [#allocation6], 512  }
  0x26   :  { %245 = vsyncadd [#allocation6], 4294966784  ;;  %v252_v0 = vmov 0.0|0.0   ;;  %vm253_vm0 = vmmov 0   ;;  %v254_v1 = vmov 0.0   ;;  %v42_v2 = vld [vmem:[#allocation5] sm:$0xff] }
  0x27   :  { %162 = vmatprep.subr.bf16.mxu0 %v252_v0  ;;  %159 = vmatprep.mubr.msk.f32.mxu0 %vm253_vm0, %v254_v1  ;;  %v43_v3 = vld [vmem:[#allocation5 + $0x8] sm:$0xff]  ;;  %v44_v4 = vld [vmem:[#allocation5 + $0x10] sm:$0xff]  ;;  %v45_v6 = vld [vmem:[#allocation5 + $0x18] sm:$0xff]  ;;  %vm53_vm1 = vcmask 261120   ;;  %s255_s11 = smov [#allocation7]  }
  0x28   :  { %v163_v5 = vpack.c.bf16 %v43_v3, %v42_v2  ;;  %v166_v7 = vpack.c.bf16 %v45_v6, %v44_v4  ;;  %v41_v8 = vld [vmem:[#allocation2] sm:$0xff]  ;;  %s134_s12 = sshll.u32 %s255_s11, 4  ;;  %s135_s12 = int_to_ptr.vmem [resolvable:$true] %s134_s12 }
  0x29   :  { %v144_v9 = vld [vmem:[%s324_s2] ss:$0 sm:$0xff]  ;;  %s220_s13 = scalar_lea.vmem %s135_s12, 128  ;;  %p225_p3 = scmp.lt.s32.totalorder %s135_s12, %s135_s12 }
  0x2a   :  { %164 = vmatpush3.bf16.msra.mxu0 %v163_v5  ;;  %p221_p2 = scmp.ne.s32.totalorder %s135_s12, %s220_s13  ;;  %p226_p4 = scmp.lt.s32.totalorder %s220_s13, %s220_s13 }
  0x2b   :  { %165 = vmatprep.subr.bf16.mxu0 %v252_v0 }
  0x2c   :  { %p227_p5 = por %p226_p4, %p225_p3 }
  0x2e   :  { %167 = vmatpush3.bf16.msra.mxu0 %v166_v7  ;;  %p228_p6 = pnand %p227_p5, %p221_p2 }
  0x31   :  { %160 = vmatmul.mubr.msk.f32.vlgmr.msra.gmra.mrb[0].mxu0 %vm53_vm1, %v41_v8 }
 0x104   :  { %v123_v10 = vpop.f32.mrb[0].mxu0 }
 0x105   :  { %v124_v11 = vadd.f32 %v144_v9, %v123_v10  ;;  %v161_v12 = vpop.f32.mrb[1].mxu0 }
 0x107   :  { %127 = vst [vmem:[#allocation7] sm:$0xff] %v124_v11 }
 0x108   :  { %231 = shalt.err (!%p228_p6)
}
 0x109   :  { %s232_s16 = scalar_lea.hbm %s325_s3, 128 }
 0x10a   :  { %p233_p7 = scmp.ne.s32.totalorder %s325_s3, %s232_s16  ;;  %p236_p8 = scmp.lt.u32.totalorder %s232_s16, %s325_s3 }
 0x10c   :  { %p238_p9 = pnand %p236_p8, %p233_p7 }
 0x10e   :  { %241 = shalt.err (!%p238_p9)
}
 0x10f   :  { %137 = dma.vmem_to_hbm [thread:$0]  %s135_s12, 128, %s325_s3, [#allocation4]  }
 0x110   :  { %246 = dma.done.wait [#allocation4], 128  }
 0x111   :  { %247 = vsyncadd [#allocation4], 4294967168 }
 0x112   :  { %141 = vsyncpa [#allocation3], 1 }
 0x113   :  { %142 = vsyncpa [#allocation6], 1 }
 0x114   :  { %143 = vsyncpa [#allocation4], 1 }

</bundles_post_ra>
